<compile_context>
chip_gen: v7x
topology: tpu7x:2x2x1
jax: 0.10.0
libtpu: 0.0.40
codegen_flags: <defaults>
</compile_context>

<pallas_src>
import functools
import math

import numpy as np

import jax
import jax.numpy as jnp
from jax.experimental import pallas as pl
from jax.experimental.pallas import tpu as pltpu


def _round_up(x, m):
    return ((x + m - 1) // m) * m


def _lcm(a, b):
    return a * b // math.gcd(a, b)


def _fold_factor(c):
    """Number of rows folded onto the lane axis so a folded row is ~lane-dense."""
    if c >= 128 or c % 128 == 0:
        return 1
    g = _lcm(c, 128) // c          # exact multiple of 128 lanes
    if g <= 32:
        return g
    g = 128 // c                   # fall back to ~one dense vreg row
    return g if g >= 2 else 1


def _pow_beta(x, beta):
    """x ** beta, plain multiplies for small integer beta (stays off the EUP)."""
    b = float(beta)
    if b.is_integer() and 0 <= b <= 8:
        n = int(b)
        if n == 0:
            return jnp.ones_like(x)
        r = x
        for _ in range(n - 1):
            r = r * x
        return r
    return jnp.power(x, b)


def _neg_loss(x, beta, use_sigmoid):
    """Per-element negative-target QFL term: BCE(x, 0) * scale(x)**beta."""
    if use_sigmoid:
        e = jnp.exp(-jnp.abs(x))
        sp = jnp.maximum(x, 0.0) + jnp.log1p(e)        # softplus(x) == BCEWithLogits(x, 0)
        sig = jnp.where(x >= 0.0, 1.0, e) / (1.0 + e)  # sigmoid(x), reuses e (one less exp)
        return sp * _pow_beta(sig, beta)
    eps = 1e-12
    p = jnp.clip(x, eps, 1.0 - eps)
    return (-jnp.log1p(-p)) * _pow_beta(x, beta)       # BCE(p, 0) = -log(1 - p)


# ----------------------------------------------------------------------------
# Kernels
# ----------------------------------------------------------------------------
def _qfl_fold_kernel(pred_ref, lab_ref, rep_ref, col_ref, smat_ref,
                     neg_ref, pat_ref, *, beta, use_sigmoid):
    """Lane-folded tile: pred (tn, L=g*C); lab (tn, g); outputs (tn, g)."""
    x = pred_ref[...].astype(jnp.float32)                       # (tn, L)
    loss_neg = _neg_loss(x, beta, use_sigmoid)

    # Broadcast each sub-row's label across its C-lane segment on the idle MXU
    # (labels < 128, so this is exact), then compare against per-lane class ids.
    lab_b = jnp.dot(lab_ref[...], rep_ref[...],
                    preferred_element_type=jnp.float32,
                    precision=jax.lax.Precision.HIGHEST)        # (tn, L)
    mask = lab_b == col_ref[...]                                # (1, L) broadcasts

    # Segmented (per original row) reductions as matmuls on the idle MXU.
    smat = smat_ref[...]                                        # (L, g)
    neg_ref[...] = jnp.dot(loss_neg, smat,
                           preferred_element_type=jnp.float32,
                           precision=jax.lax.Precision.HIGHEST)
    pat_ref[...] = jnp.dot(jnp.where(mask, x, 0.0), smat,
                           preferred_element_type=jnp.float32,
                           precision=jax.lax.Precision.HIGHEST)


def _qfl_flat_kernel(pred_ref, lab_ref, neg_ref, pat_ref, *, beta, use_sigmoid):
    """Unfolded tile (C >= 128 or fold not free): pred (tn, C); lab (tn, 1)."""
    x = pred_ref[...].astype(jnp.float32)                       # (tn, C)
    loss_neg = _neg_loss(x, beta, use_sigmoid)
    col = jax.lax.broadcasted_iota(jnp.int32, x.shape, 1)
    mask = lab_ref[...] == col                                  # (tn, 1) broadcasts
    neg_ref[...] = jnp.sum(loss_neg, axis=1, keepdims=True)
    pat_ref[...] = jnp.sum(jnp.where(mask, x, 0.0), axis=1, keepdims=True)


# ----------------------------------------------------------------------------
# Wrapper
# ----------------------------------------------------------------------------
@functools.partial(jax.jit, static_argnames=("beta", "use_sigmoid"))
def quality_focal_loss_pallas(pred, label, score, *, beta=2.0, use_sigmoid=True):
    """pred: (N, C) float, label: (N,) int, score: (N,) float -> (N,) float32."""
    n, c = pred.shape
    label = label.astype(jnp.int32)
    score = score.astype(jnp.float32)
    valid = (label >= 0) & (label < c)
    lab1 = jnp.where(valid, label, -1)

    # ---- lane folding policy -------------------------------------------------
    g = _fold_factor(c)
    if g > 1:
        if n % g == 0 and (n // g) >= 8:
            n_pad = n                          # free (bitcast) fold, no pred copy
        elif c <= 32:
            n_pad = _round_up(n, 8 * g)        # one extra HBM pass; huge compute win
        else:
            g, n_pad = 1, n                    # stay pad-free at moderate C
    else:
        n_pad = n

    if g > 1:
        pred_in = pred
        lab_in = lab1.astype(jnp.float32)
        if n_pad != n:
            pred_in = jnp.pad(pred_in, ((0, n_pad - n), (0, 0)))
            lab_in = jnp.pad(lab_in, (0, n_pad - n), constant_values=-1.0)
        rows, L = n_pad // g, g * c
        pred_f = pred_in.reshape(rows, L)
        lab_f = lab_in.reshape(rows, g)
        gcol = g
    else:
        rows, L = n, c
        pred_f = pred
        lab_f = lab1.reshape(rows, 1)
        gcol = 1

    # ---- row-tile sizing: ~<=6 MiB double-buffered VMEM, enough grid steps ----
    l_pad = _round_up(L, 128)
    if g > 1:
        const_bytes = 2 * 4 * (max(g, 8) * l_pad + L * 128 + 8 * l_pad)
    else:
        const_bytes = 0
    budget = 6 * 1024 * 1024 - const_bytes
    tn = max(8, (budget // (8 * (l_pad + 3 * 128))) // 8 * 8)
    if rows > 8 * 512:                          # aim for >= ~8 pipeline steps
        tn = min(tn, max(512, _round_up(pl.cdiv(rows, 8), 8)))
    if rows <= tn:
        tn = rows
    steps = pl.cdiv(rows, tn)

    out_shape = (jax.ShapeDtypeStruct((rows, gcol), jnp.float32),
                 jax.ShapeDtypeStruct((rows, gcol), jnp.float32))
    out_specs = (pl.BlockSpec((tn, gcol), lambda i: (i, 0)),
                 pl.BlockSpec((tn, gcol), lambda i: (i, 0)))

    if g > 1:
        # Small constant matrices for the MXU broadcast / segmented sums.
        seg = np.arange(L, dtype=np.int64) // c
        rep = jnp.asarray((np.arange(g)[:, None] == seg[None, :]).astype(np.float32))
        smat = jnp.asarray((seg[:, None] == np.arange(g)[None, :]).astype(np.float32))
        colmod = jnp.asarray((np.arange(L, dtype=np.int64) % c).astype(np.float32)
                             ).reshape(1, L)
        kernel = functools.partial(_qfl_fold_kernel, beta=float(beta),
                                   use_sigmoid=bool(use_sigmoid))
        operands = (pred_f, lab_f, rep, colmod, smat)
        in_specs = [
            pl.BlockSpec((tn, L), lambda i: (i, 0)),
            pl.BlockSpec((tn, g), lambda i: (i, 0)),
            pl.BlockSpec((g, L), lambda i: (0, 0)),     # DMA'd once (constant block)
            pl.BlockSpec((1, L), lambda i: (0, 0)),
            pl.BlockSpec((L, g), lambda i: (0, 0)),
        ]
    else:
        kernel = functools.partial(_qfl_flat_kernel, beta=float(beta),
                                   use_sigmoid=bool(use_sigmoid))
        operands = (pred_f, lab_f)
        in_specs = [
            pl.BlockSpec((tn, L), lambda i: (i, 0)),
            pl.BlockSpec((tn, 1), lambda i: (i, 0)),
        ]

    neg_sum, pred_at = pl.pallas_call(
        kernel,
        out_shape=out_shape,
        grid=(steps,),
        in_specs=in_specs,
        out_specs=out_specs,
        compiler_params=pltpu.CompilerParams(
            dimension_semantics=("parallel",),
            vmem_limit_bytes=32 * 1024 * 1024,
        ),
        cost_estimate=pl.CostEstimate(
            flops=int(rows * L * (14 + 6 * gcol)),
            transcendentals=int(3 * rows * L),
            bytes_accessed=int(pred.dtype.itemsize * rows * L
                               + 4 * rows * 3 * gcol + const_bytes),
        ),
    )(*operands)

    # ---- O(N) positive-branch correction, derived from the extracted logit ----
    neg_sum = neg_sum.reshape(-1)[:n]
    pred_at = pred_at.reshape(-1)[:n]
    if use_sigmoid:
        e = jnp.exp(-jnp.abs(pred_at))
        sp = jnp.maximum(pred_at, 0.0) + jnp.log1p(e)
        ps = jnp.where(pred_at >= 0.0, 1.0, e) / (1.0 + e)
        bce_pos = sp - pred_at * score                      # BCEWithLogits(x, score)
        neg_at = sp * _pow_beta(ps, beta)                   # same formula as in-kernel
    else:
        eps = 1e-12
        p = jnp.clip(pred_at, eps, 1.0 - eps)
        bce_pos = -(score * jnp.log(p) + (1.0 - score) * jnp.log1p(-p))
        neg_at = (-jnp.log1p(-p)) * _pow_beta(pred_at, beta)
        ps = pred_at
    loss_pos = bce_pos * _pow_beta(jnp.abs(score - ps), beta)
    # Keep the validity gate: pred_at-derived terms are meaningless for rows
    # without a positive label.
    return neg_sum + jnp.where(valid, loss_pos - neg_at, 0.0)


def quality_focal_loss_ref(pred, label, score, *, beta=2.0, use_sigmoid=True):
    """Pure-JAX reference mirroring the PyTorch code (sanity check)."""
    n, c = pred.shape
    if use_sigmoid:
        ps = jax.nn.sigmoid(pred)
        bce = lambda x, z: jnp.maximum(x, 0.0) - x * z + jnp.log1p(jnp.exp(-jnp.abs(x)))
    else:
        ps = pred
        eps = 1e-12

        def bce(p, z):
            p = jnp.clip(p, eps, 1.0 - eps)
            return -(z * jnp.log(p) + (1.0 - z) * jnp.log(1.0 - p))

    loss = bce(pred, jnp.zeros_like(pred)) * jnp.power(ps, beta)
    col = jnp.arange(c)[None, :]
    pos_mask = (label[:, None] >= 0) & (label[:, None] < c) & (col == label[:, None])
    sf = score[:, None] - ps
    loss_pos = bce(pred, jnp.broadcast_to(score[:, None], (n, c))) * jnp.power(
        jnp.abs(sf), beta
    )
    loss = jnp.where(pos_mask, loss_pos, loss)
    return loss.sum(axis=1)


class QualityFocalLoss:
    """JAX/Pallas counterpart of the PyTorch QualityFocalLoss module."""

    def __init__(self, use_sigmoid=True, beta=2.0):
        self.use_sigmoid = use_sigmoid
        self.beta = beta

    def __call__(self, pred, target):
        label, score = target
        return quality_focal_loss_pallas(
            pred, label, score, beta=self.beta, use_sigmoid=self.use_sigmoid
        )


if __name__ == "__main__":
    key = jax.random.PRNGKey(0)
    k1, k2, k3, k4 = jax.random.split(key, 4)

    def _check(name, pred, label, score, beta, use_sigmoid):
        out = jax.block_until_ready(
            quality_focal_loss_pallas(pred, label, score, beta=beta,
                                      use_sigmoid=use_sigmoid)
        )
        ref = quality_focal_loss_ref(pred, label, score, beta=beta,
                                     use_sigmoid=use_sigmoid)
        if not jnp.allclose(out, ref, atol=1e-5, rtol=1e-4):
            raise AssertionError(f"Pallas QFL mismatch in case: {name}")

    # --- small logits case, C=8 (lane-folded g=16 path) ---
    N, C = 16, 8
    pred = jax.random.normal(k1, (N, C), dtype=jnp.float32) * 2.0
    label = jax.random.randint(k2, (N,), 0, C + 1, dtype=jnp.int32)   # C == background
    score = jax.random.uniform(k3, (N,), dtype=jnp.float32)
    _check("C=8 sigmoid", pred, label, score, 2.0, True)

    # --- odd N (exercises the padded fold branch) ---
    N2 = 37
    pred2 = jax.random.normal(k4, (N2, C), dtype=jnp.float32) * 2.0
    label2 = jax.random.randint(k2, (N2,), 0, C + 1, dtype=jnp.int32)
    score2 = jax.random.uniform(k3, (N2,), dtype=jnp.float32)
    _check("C=8 odd N", pred2, label2, score2, 2.0, True)

    # --- probability-input case (use_sigmoid=False) ---
    pred_p = jax.random.uniform(k1, (N, C), dtype=jnp.float32, minval=0.02, maxval=0.98)
    _check("C=8 prob", pred_p, label, score, 2.0, False)

    # --- C multiple of 128 (unfolded / flat path) ---
    N3, C3 = 24, 128
    pred3 = jax.random.normal(k1, (N3, C3), dtype=jnp.float32) * 2.0
    label3 = jax.random.randint(k2, (N3,), 0, C3 + 1, dtype=jnp.int32)
    score3 = jax.random.uniform(k3, (N3,), dtype=jnp.float32)
    _check("C=128 sigmoid", pred3, label3, score3, 2.0, True)

    # --- COCO-like C=80 with free (bitcast) fold, L = 640 lanes ---
    N4, C4 = 640, 80
    pred4 = jax.random.normal(k4, (N4, C4), dtype=jnp.float32) * 2.0
    label4 = jax.random.randint(k2, (N4,), 0, C4 + 1, dtype=jnp.int32)
    score4 = jax.random.uniform(k3, (N4,), dtype=jnp.float32)
    _check("C=80 sigmoid", pred4, label4, score4, 2.0, True)

    print("KERNEL_OK")
</pallas_src>

<mosaic_0001>
module attributes {stable_mosaic.version = 11 : i64} {
  func.func @_qfl_fold_kernel(%arg0: i32, %arg1: memref<8x128xf32, #tpu.memory_space<vmem>>, %arg2: memref<8x16xf32, #tpu.memory_space<vmem>>, %arg3: memref<16x128xf32, #tpu.memory_space<vmem>>, %arg4: memref<1x128xf32, #tpu.memory_space<vmem>>, %arg5: memref<128x16xf32, #tpu.memory_space<vmem>>, %arg6: memref<8x16xf32, #tpu.memory_space<vmem>>, %arg7: memref<8x16xf32, #tpu.memory_space<vmem>>) attributes {dimension_semantics = [#tpu.dimension_semantics<parallel>], iteration_bounds = array<i64: 1>, scalar_prefetch = 0 : i64, scratch_operands = 0 : i64, tpu.core_type = #tpu.core_type<tc>, window_params = [{transform_indices = @transform_0, window_bounds = array<i64: 8, 128>}, {transform_indices = @transform_1, window_bounds = array<i64: 8, 16>}, {pipeline_mode = #tpu.pipeline_mode<synchronous>, transform_indices = @transform_2, window_bounds = array<i64: 16, 128>}, {pipeline_mode = #tpu.pipeline_mode<synchronous>, transform_indices = @transform_3, window_bounds = array<i64: 1, 128>}, {pipeline_mode = #tpu.pipeline_mode<synchronous>, transform_indices = @transform_4, window_bounds = array<i64: 128, 16>}, {transform_indices = @transform_5, window_bounds = array<i64: 8, 16>}, {transform_indices = @transform_6, window_bounds = array<i64: 8, 16>}]} {
    %c0 = arith.constant 0 : index
    %c0_0 = arith.constant 0 : index
    %0 = vector.load %arg1[%c0, %c0_0] : memref<8x128xf32, #tpu.memory_space<vmem>>, vector<8x128xf32>
    %1 = math.absf %0 : vector<8x128xf32>
    %cst = arith.constant 0.000000e+00 : f32
    %2 = vector.broadcast %cst : f32 to vector<8x128xf32>
    %3 = arith.subf %2, %1 : vector<8x128xf32>
    %4 = math.exp %3 : vector<8x128xf32>
    %cst_1 = arith.constant 0.000000e+00 : f32
    %5 = vector.broadcast %cst_1 : f32 to vector<8x128xf32>
    %6 = arith.maximumf %0, %5 : vector<8x128xf32>
    %7 = math.log1p %4 : vector<8x128xf32>
    %8 = arith.addf %6, %7 : vector<8x128xf32>
    %cst_2 = arith.constant 0.000000e+00 : f32
    %9 = vector.broadcast %cst_2 : f32 to vector<8x128xf32>
    %10 = arith.cmpf oge, %0, %9 : vector<8x128xf32>
    %cst_3 = arith.constant 1.000000e+00 : f32
    %11 = vector.broadcast %cst_3 : f32 to vector<8x128xf32>
    %12 = arith.select %10, %11, %4 : vector<8x128xi1>, vector<8x128xf32>
    %cst_4 = arith.constant 1.000000e+00 : f32
    %13 = vector.broadcast %cst_4 : f32 to vector<8x128xf32>
    %14 = arith.addf %13, %4 : vector<8x128xf32>
    %15 = arith.divf %12, %14 : vector<8x128xf32>
    %16 = arith.mulf %15, %15 : vector<8x128xf32>
    %17 = arith.mulf %8, %16 : vector<8x128xf32>
    %c0_5 = arith.constant 0 : index
    %c0_6 = arith.constant 0 : index
    %18 = vector.load %arg2[%c0_5, %c0_6] : memref<8x16xf32, #tpu.memory_space<vmem>>, vector<8x16xf32>
    %c0_7 = arith.constant 0 : index
    %c0_8 = arith.constant 0 : index
    %19 = vector.load %arg3[%c0_7, %c0_8] : memref<16x128xf32, #tpu.memory_space<vmem>>, vector<16x128xf32>
    %cst_9 = arith.constant dense<0.000000e+00> : vector<8x128xf32>
    %20 = tpu.matmul %18, %19, %cst_9 {dimension_numbers = #tpu.dot_dimension_numbers<[1], [0], [0], [1], [0, 0, 1, 1], [], []>, precision = #tpu.contract_precision<fp32>} : vector<8x16xf32>, vector<16x128xf32>, vector<8x128xf32> -> vector<8x128xf32>
    %c0_10 = arith.constant 0 : index
    %c0_11 = arith.constant 0 : index
    %21 = vector.load %arg4[%c0_10, %c0_11] : memref<1x128xf32, #tpu.memory_space<vmem>>, vector<1x128xf32>
    %22 = vector.broadcast %21 : vector<1x128xf32> to vector<8x128xf32>
    %23 = arith.cmpf oeq, %20, %22 : vector<8x128xf32>
    %c0_12 = arith.constant 0 : index
    %c0_13 = arith.constant 0 : index
    %24 = vector.load %arg5[%c0_12, %c0_13] : memref<128x16xf32, #tpu.memory_space<vmem>>, vector<128x16xf32>
    %cst_14 = arith.constant dense<0.000000e+00> : vector<8x16xf32>
    %25 = tpu.matmul %17, %24, %cst_14 {dimension_numbers = #tpu.dot_dimension_numbers<[1], [0], [0], [1], [0, 0, 1, 1], [], []>, precision = #tpu.contract_precision<fp32>} : vector<8x128xf32>, vector<128x16xf32>, vector<8x16xf32> -> vector<8x16xf32>
    %c0_15 = arith.constant 0 : index
    %c0_16 = arith.constant 0 : index
    %26 = vector.load %arg6[%c0_15, %c0_16] : memref<8x16xf32, #tpu.memory_space<vmem>>, vector<8x16xf32>
    tpu.vector_store %arg6[%c0_15, %c0_16], %25 {strides = array<i32>} : memref<8x16xf32, #tpu.memory_space<vmem>>, vector<8x16xf32>,
    %cst_17 = arith.constant 0.000000e+00 : f32
    %27 = vector.broadcast %cst_17 : f32 to vector<8x128xf32>
    %28 = arith.select %23, %0, %27 : vector<8x128xi1>, vector<8x128xf32>
    %cst_18 = arith.constant dense<0.000000e+00> : vector<8x16xf32>
    %29 = tpu.matmul %28, %24, %cst_18 {dimension_numbers = #tpu.dot_dimension_numbers<[1], [0], [0], [1], [0, 0, 1, 1], [], []>, precision = #tpu.contract_precision<fp32>} : vector<8x128xf32>, vector<128x16xf32>, vector<8x16xf32> -> vector<8x16xf32>
    %c0_19 = arith.constant 0 : index
    %c0_20 = arith.constant 0 : index
    %30 = vector.load %arg7[%c0_19, %c0_20] : memref<8x16xf32, #tpu.memory_space<vmem>>, vector<8x16xf32>
    tpu.vector_store %arg7[%c0_19, %c0_20], %29 {strides = array<i32>} : memref<8x16xf32, #tpu.memory_space<vmem>>, vector<8x16xf32>,
    return
  }
  func.func @transform_0(%arg0: i32) -> (i32, i32) {
    %c0_i32 = arith.constant 0 : i32
    %c0_i32_0 = arith.constant 0 : i32
    return %arg0, %c0_i32 : i32, i32
  }
  func.func @transform_1(%arg0: i32) -> (i32, i32) {
    %c0_i32 = arith.constant 0 : i32
    %c0_i32_0 = arith.constant 0 : i32
    return %arg0, %c0_i32 : i32, i32
  }
  func.func @transform_2(%arg0: i32) -> (i32, i32) {
    %c0_i32 = arith.constant 0 : i32
    %c0_i32_0 = arith.constant 0 : i32
    %c0_i32_1 = arith.constant 0 : i32
    return %c0_i32, %c0_i32_0 : i32, i32
  }
  func.func @transform_3(%arg0: i32) -> (i32, i32) {
    %c0_i32 = arith.constant 0 : i32
    %c0_i32_0 = arith.constant 0 : i32
    %c0_i32_1 = arith.constant 0 : i32
    return %c0_i32, %c0_i32_0 : i32, i32
  }
  func.func @transform_4(%arg0: i32) -> (i32, i32) {
    %c0_i32 = arith.constant 0 : i32
    %c0_i32_0 = arith.constant 0 : i32
    %c0_i32_1 = arith.constant 0 : i32
    return %c0_i32, %c0_i32_0 : i32, i32
  }
  func.func @transform_5(%arg0: i32) -> (i32, i32) {
    %c0_i32 = arith.constant 0 : i32
    %c0_i32_0 = arith.constant 0 : i32
    return %arg0, %c0_i32 : i32, i32
  }
  func.func @transform_6(%arg0: i32) -> (i32, i32) {
    %c0_i32 = arith.constant 0 : i32
    %c0_i32_0 = arith.constant 0 : i32
    return %arg0, %c0_i32 : i32, i32
  }
}

</mosaic_0001>

<bundles_post_ra>
// kernel: quality_focal_loss_pallas.1
= control target key start
LH: loop header
LB: loop body
LE: loop exit
PB: predicated region body
PF: predicated region fallthrough
CT: control target
= control target key end

     0   :  { %vm48_vm0 = vcmask 130048   ;;  %v2857_v0 = vmov 0.0|0.0   ;;  %vm2858_vm1 = vmmov 0   ;;  %v2859_v3 = vmov 0.0   ;;  %s3439_s2 = inlined_call_operand.vmem [shape: f32[16,128], index: 2, kind: input, shape index: {}]   ;;  %s3440_s1 = inlined_call_operand.vmem [shape: f32[8,16], index: 1, kind: input, shape index: {}]   ;;  %s3441_s0 = inlined_call_operand.vmem [shape: f32[8,128], index: 0, kind: input, shape index: {}]   ;;  %s3442_s4 = inlined_call_operand.vmem [shape: f32[128,16], index: 4, kind: input, shape index: {}]   ;;  %s3443_s3 = inlined_call_operand.vmem [shape: f32[1,128], index: 3, kind: input, shape index: {}]   ;;  %s3444_s5 = inlined_call_operand.vmem [shape: f32[8,16], index: 5, kind: output, shape index: {0}]   ;;  %s3445_s6 = inlined_call_operand.vmem [shape: f32[8,16], index: 6, kind: output, shape index: {1}]  }
   0x1   :  { %2522 = vmatprep.subr.bf16.mxu0 %v2857_v0  ;;  %v46_v1 = vld [vmem:[%s3439_s2] sm:$0xff]  ;;  %v47_v2 = vld [vmem:[%s3439_s2 + $0x8] sm:$0xff]  ;;  %2076 = vmatprep.mubr.msk.f32.mxu0 %vm2858_vm1, %v2859_v3  ;;  %v521_v33 = vld [vmem:[%s3442_s4 + $0x10] sm:$0xff] }
   0x2   :  { %v45_v4 = vld [vmem:[%s3440_s1] sm:$0xff]  ;;  %v53_v5 = vand.u32 4294901760, %v46_v1  ;;  %v56_v6 = vand.u32 4294901760, %v47_v2  ;;  %2513 = vmatprep.subr.bf16.mxu1 %v2857_v0  ;;  %2055 = vmatprep.mubr.msk.f32.mxu1 %vm2858_vm1, %v2859_v3  ;;  %v520_v29 = vld [vmem:[%s3442_s4 + $0x8] sm:$0xff]  ;;  %v522_v34 = vld [vmem:[%s3442_s4 + $0x18] sm:$0xff]  ;;  %v542_v36 = vand.u32 4294901760, %v521_v33 }
   0x3   :  { %v50_v7 = vsel %vm48_vm0, %v45_v4, 0  ;;  %v2916_v20 = vld [vmem:[%s3441_s0] sm:$0xff]  ;;  %v539_v32 = vand.u32 4294901760, %v520_v29  ;;  %v545_v37 = vand.u32 4294901760, %v522_v34  ;;  %v524_v39 = vld [vmem:[%s3442_s4 + $0x28] sm:$0xff]  ;;  %v525_v40 = vld [vmem:[%s3442_s4 + $0x30] sm:$0xff] }
   0x4   :  { %v119_v8 = vand.u32 4294901760, %v50_v7  ;;  %v2514_v9 = vpack.c.bf16 %v56_v6, %v53_v5  ;;  %v131_v10 = vsub.f32 %v46_v1, %v53_v5  ;;  %v138_v11 = vsub.f32 %v47_v2, %v56_v6  ;;  %v519_v28 = vld [vmem:[%s3442_s4] sm:$0xff]  ;;  %v526_v41 = vld [vmem:[%s3442_s4 + $0x38] sm:$0xff]  ;;  %v528_v51 = vld [vmem:[%s3442_s4 + $0x48] sm:$0xff] }
   0x5   :  { %v23_v25 = vand.u32 2147483647, %v2916_v20  ;;  %v536_v31 = vand.u32 4294901760, %v519_v28  ;;  %v523_v38 = vld [vmem:[%s3442_s4 + $0x20] sm:$0xff]  ;;  %v551_v44 = vand.u32 4294901760, %v524_v39  ;;  %v2963_v45 = vpack.c.bf16 %v545_v37, %v542_v36  ;;  %v529_v5 = vld [vmem:[%s3442_s4 + $0x50] sm:$0xff] }
   0x6   :  { %v120_v12 = vsub.f32 %v50_v7, %v119_v8  ;;  %2524 = vmatpush3.bf16.msra.mxu0 %v2514_v9  ;;  %2515 = vmatpush3.bf16.msra.mxu1 %v2514_v9  ;;  %v132_v13 = vand.u32 4294901760, %v131_v10  ;;  %v139_v14 = vand.u32 4294901760, %v138_v11  ;;  %v2520_v30 = vpack.c.bf16 %v138_v11, %v131_v10  ;;  %v2972_v50 = vld [vmem:[%s3442_s4 + $0x40] sm:$0xff] }
   0x7   :  { %2516 = vmatprep.subr.bf16.mxu1 %v2857_v0  ;;  %2525 = vmatprep.subr.bf16.mxu0 %v2857_v0  ;;  %v24_v26 = vsub.f32 0.0, %v23_v25  ;;  %v2943_v35 = vpack.c.bf16 %v539_v32, %v536_v31  ;;  %v548_v43 = vand.u32 4294901760, %v523_v38  ;;  %v554_v46 = vand.u32 4294901760, %v525_v40 }
   0x8   :  { %v121_v15 = vand.u32 4294901760, %v120_v12  ;;  %v133_v16 = vsub.f32 %v131_v10, %v132_v13  ;;  %v140_v17 = vsub.f32 %v138_v11, %v139_v14  ;;  %v2526_v18 = vpack.c.bf16 %v139_v14, %v132_v13 }
   0x9   :  { %v25_v27 = vmul.f32 1.442695, %v24_v26  ;;  %v2966_v48 = vsub.f32 %v519_v28, %v536_v31  ;;  %v557_v49 = vand.u32 4294901760, %v526_v41  ;;  %v2979_v52 = vsub.f32 %v520_v29, %v539_v32 }
   0xa   :  { %2077 = vmatmul.mubr.f32.vlgmr.msra.gmra.mrb[0].mxu0 %v121_v15  ;;  %v122_v19 = vsub.f32 %v120_v12, %v121_v15  ;;  %v134_v21 = vand.u32 4294901760, %v133_v16  ;;  %v141_v22 = vand.u32 4294901760, %v140_v17  ;;  %v2981_v53 = vsub.f32 %v521_v33, %v542_v36 }
   0xb   :  { %2527 = vmatpush3.bf16.msra.mxu0 %v2526_v18  ;;  %2083 = vmatprep.mubr.msk.f32.mxu0 %vm2858_vm1, %v2859_v3  ;;  %2851 = vpow2.f32 %v25_v27  ;;  %v2983_v54 = vsub.f32 %v522_v34, %v545_v37  ;;  %v2986_v55 = vsub.f32 %v523_v38, %v548_v43  ;;  %v2988_v56 = vsub.f32 %v524_v39, %v551_v44 }
   0xc   :  { %v123_v23 = vand.u32 4294901760, %v122_v19  ;;  %2528 = vmatprep.subr.bf16.mxu0 %v2857_v0  ;;  %v2517_v24 = vpack.c.bf16 %v141_v22, %v134_v21  ;;  %v2990_v57 = vsub.f32 %v525_v40, %v554_v46  ;;  %v2995_v59 = vpack.c.bf16 %v551_v44, %v548_v43  ;;  %v531_v22 = vld [vmem:[%s3442_s4 + $0x60] sm:$0xff]  ;;  %v533_v40 = vld [vmem:[%s3442_s4 + $0x70] sm:$0xff]  ;;  %v534_v43 = vld [vmem:[%s3442_s4 + $0x78] sm:$0xff] }
   0xd   :  { %v560_v60 = vand.u32 4294901760, %v2972_v50  ;;  %v563_v61 = vand.u32 4294901760, %v528_v51  ;;  %v2998_v62 = vsub.f32 %v526_v41, %v557_v49  ;;  %v629_v63 = vand.u32 4294901760, %v2966_v48 }
   0xe   :  { %2056 = vmatmul.mubr.f32.vlgmr.msra.gmra.mrb[0].mxu1 %v123_v23  ;;  %v636_v1 = vand.u32 4294901760, %v2979_v52  ;;  %v643_v2 = vand.u32 4294901760, %v2981_v53  ;;  %v650_v4 = vand.u32 4294901760, %v2983_v54  ;;  %vm38_vm2 = vcmp.ge.f32.partialorder %v2916_v20, 0.0 }
   0xf   :  { %2518 = vmatpush3.bf16.msra.mxu1 %v2517_v24  ;;  %2062 = vmatprep.mubr.msk.f32.mxu1 %vm2858_vm1, %v2859_v3  ;;  %v657_v6 = vand.u32 4294901760, %v2986_v55  ;;  %v664_v7 = vand.u32 4294901760, %v2988_v56  ;;  %v3017_v11 = vsub.f32 %v2972_v50, %v560_v60  ;;  %v678_v15 = vand.u32 4294901760, %v2998_v62  ;;  %v532_v24 = vld [vmem:[%s3442_s4 + $0x68] sm:$0xff] }
  0x10   :  { %2519 = vmatprep.subr.bf16.mxu1 %v2857_v0  ;;  %v3029_v13 = vpack.c.bf16 %v650_v4, %v643_v2  ;;  %v3034_v16 = vsub.f32 %v528_v51, %v563_v61  ;;  %v3044_v18 = vpack.c.bf16 %v557_v49, %v554_v46  ;;  %v566_v19 = vand.u32 4294901760, %v529_v5 }
  0x11   :  { %v3040_v17 = vpack.c.bf16 %v664_v7, %v657_v6  ;;  %v27_v25 = vmax.f32 %v2916_v20, 0.0  ;;  %v685_v31 = vand.u32 4294901760, %v3017_v11  ;;  %v3077_v36 = vpack.c.bf16 %v563_v61, %v560_v60 }
  0x12   :  { %2084 = vmatmul.mubr.f32.vlgmr.msra.gmra.mrb[0].mxu0 %v119_v8  ;;  %v3064_v28 = vsub.f32 %v529_v5, %v566_v19  ;;  %v692_v32 = vand.u32 4294901760, %v3034_v16  ;;  %v572_v37 = vand.u32 4294901760, %v531_v22  ;;  %v575_v39 = vand.u32 4294901760, %v532_v24 }
  0x13   :  { %2530 = vmatpush3.bf16.msra.mxu0 %v2514_v9  ;;  %2090 = vmatprep.mubr.msk.f32.mxu0 %vm2858_vm1, %v2859_v3  ;;  %v530_v9 = vld [vmem:[%s3442_s4 + $0x58] sm:$0xff]  ;;  %v578_v61 = vand.u32 4294901760, %v533_v40  ;;  %v581_v5 = vand.u32 4294901760, %v534_v43 }
  0x14   :  { %2675 = vmatprep.subr.bf16.mxu0 %v2857_v0  ;;  %v569_v21 = vand.u32 4294901760, %v530_v9  ;;  %v699_v46 = vand.u32 4294901760, %v3064_v28 }
  0x15   :  { %v2961_v42 = vpop.eup %2851 }
  0x16   :  { %2063 = vmatmul.mubr.f32.vlgmr.msra.gmra.mrb[0].mxu1 %v119_v8  ;;  %v28_v47 = vadd.f32 1.0, %v2961_v42  ;;  %v31_v58 = vmul.f32 -0.5, %v2961_v42  ;;  %v34_v14 = vand.u32 2147483647, %v2961_v42  ;;  %v39_v27 = vsel %vm38_vm2, 1.0, %v2961_v42 }
  0x17   :  { %2521 = vmatpush3.bf16.msra.mxu1 %v2520_v30  ;;  %2069 = vmatprep.mubr.msk.f32.mxu1 %vm2858_vm1, %v2859_v3  ;;  %v3073_v33 = vsub.f32 %v530_v9, %v569_v21  ;;  %v3103_v60 = vpack.c.bf16 %v569_v21, %v566_v19 }
  0x18   :  { %2531 = vmatprep.subr.bf16.mxu1 %v2857_v0  ;;  %2853 = vlog2.f32 %v28_v47  ;;  %v32_v10 = vadd.f32 1.0, %v31_v58  ;;  %vm3067_vm3 = vcmp.lt.f32.partialorder %v34_v14, 0.0004427343  ;;  %v3099_v58 = vsub.f32 %v532_v24, %v575_v39 }
  0x19   :  { %2855 = vrcp.f32 %v28_v47  ;;  %v3095_v47 = vsub.f32 %v531_v22, %v572_v37  ;;  %v706_v51 = vand.u32 4294901760, %v3073_v33  ;;  %v3112_v14 = vsub.f32 %v533_v40, %v578_v61 }
  0x1a   :  { %2091 = vmatmul.mubr.f32.vlgmr.msra.gmra.mrb[0].mxu0 %v119_v8  ;;  %v671_v8 = vand.u32 4294901760, %v2990_v57  ;;  %v33_v26 = vmul.f32 %v2961_v42, %v32_v10  ;;  %v3087_v42 = vpack.c.bf16 %v692_v32, %v685_v31  ;;  %v720_v21 = vand.u32 4294901760, %v3099_v58 }
  0x1b   :  { %2677 = vmatpush3.bf16.msra.mxu0 %v2943_v35  ;;  %2335 = vmatprep.mubr.msk.f32.mxu0 %vm2858_vm1, %v2859_v3  ;;  %v3110_v10 = vpack.c.bf16 %v706_v51, %v699_v46  ;;  %v713_v19 = vand.u32 4294901760, %v3095_v47  ;;  %v3119_v24 = vsub.f32 %v534_v43, %v581_v5  ;;  %v644_v40 = vsub.f32 %v2981_v53, %v643_v2 }
  0x1c   :  { %2678 = vmatprep.subr.bf16.mxu0 %v2857_v0  ;;  %v3054_v23 = vpack.c.bf16 %v678_v15, %v671_v8 }
  0x1d   :  { %v3135_v30 = vpack.c.bf16 %v720_v21, %v713_v19 }
  0x1e   :  { %2070 = vmatmul.mubr.f32.vlgmr.msra.gmra.mrb[0].mxu1 %v120_v12  ;;  %v3023_v12 = vpack.c.bf16 %v636_v1, %v629_v63 }
  0x1f   :  { %2533 = vmatpush3.bf16.msra.mxu1 %v2943_v35  ;;  %2125 = vmatprep.mubr.msk.f32.mxu1 %vm2858_vm1, %v2859_v3 }
  0x20   :  { %2534 = vmatprep.subr.bf16.mxu1 %v2857_v0  ;;  %2680 = vmatpush3.bf16.msra.mxu0 %v2963_v45 }
  0x21   :  { %2681 = vmatprep.subr.bf16.mxu0 %v2857_v0 }
  0x22   :  { %v2854_v29 = vpop.eup %2853 }
  0x23   :  { %2536 = vmatpush3.bf16.msra.mxu1 %v2963_v45  ;;  %v2856_v34 = vpop.eup %2855  ;;  %v30_v38 = vmul.f32 0.6931472, %v2854_v29 }
  0x24   :  { %2537 = vmatprep.subr.bf16.mxu1 %v2857_v0  ;;  %2683 = vmatpush3.bf16.msra.mxu0 %v2995_v59  ;;  %v42_v41 = vmul.f32 %v2856_v34, %v39_v27  ;;  %v637_v27 = vsub.f32 %v2979_v52, %v636_v1  ;;  %v3138_v34 = vpack.c.bf16 %v581_v5, %v578_v61 }
  0x25   :  { %2684 = vmatprep.subr.bf16.mxu0 %v2857_v0  ;;  %v36_v44 = vsel %vm3067_vm3, %v33_v26, %v30_v38  ;;  %v630_v26 = vsub.f32 %v2966_v48, %v629_v63  ;;  %v727_v38 = vand.u32 4294901760, %v3112_v14  ;;  %v734_v63 = vand.u32 4294901760, %v3119_v24 }
  0x26   :  { %v37_v49 = vadd.f32 %v36_v44, %v27_v25  ;;  %v43_v50 = vmul.f32 %v42_v41, %v42_v41  ;;  %v3123_v25 = vpack.c.bf16 %v575_v39, %v572_v37  ;;  %v638_v39 = vand.u32 4294901760, %v637_v27 }
  0x27   :  { %2539 = vmatpush3.bf16.msra.mxu1 %v2995_v59  ;;  %v631_v1 = vand.u32 4294901760, %v630_v26  ;;  %v651_v41 = vsub.f32 %v2983_v54, %v650_v4  ;;  %v3155_v44 = vpack.c.bf16 %v734_v63, %v727_v38  ;;  %v645_v4 = vand.u32 4294901760, %v644_v40 }
  0x28   :  { %2540 = vmatprep.subr.bf16.mxu1 %v2857_v0  ;;  %2686 = vmatpush3.bf16.msra.mxu0 %v3044_v18  ;;  %v44_v9 = vmul.f32 %v43_v50, %v37_v49  ;;  %v658_v50 = vsub.f32 %v2986_v55, %v657_v6  ;;  %v665_v5 = vsub.f32 %v2988_v56, %v664_v7 }
  0x29   :  { %2687 = vmatprep.subr.bf16.mxu0 %v2857_v0  ;;  %v3163_v2 = vpack.c.bf16 %v638_v39, %v631_v1  ;;  %v652_v61 = vand.u32 4294901760, %v651_v41  ;;  %v679_v1 = vsub.f32 %v2998_v62, %v678_v15  ;;  %v686_v7 = vsub.f32 %v3017_v11, %v685_v31 }
  0x2a   :  { %v3115_v22 = vand.u32 4294901760, %v44_v9  ;;  %v659_v26 = vand.u32 4294901760, %v658_v50  ;;  %v666_v27 = vand.u32 4294901760, %v665_v5  ;;  %v693_v41 = vsub.f32 %v3034_v16, %v692_v32 }
  0x2b   :  { %2542 = vmatpush3.bf16.msra.mxu1 %v3044_v18  ;;  %v3173_v6 = vpack.c.bf16 %v652_v61, %v645_v4  ;;  %v680_v40 = vand.u32 4294901760, %v679_v1  ;;  %v687_v15 = vand.u32 4294901760, %v686_v7  ;;  %v700_v31 = vsub.f32 %v3064_v28, %v699_v46 }
  0x2c   :  { %2543 = vmatprep.subr.bf16.mxu1 %v2857_v0  ;;  %2689 = vmatpush3.bf16.msra.mxu0 %v3077_v36  ;;  %v3133_v29 = vsub.f32 %v44_v9, %v3115_v22  ;;  %v672_v9 = vsub.f32 %v2990_v57, %v671_v8  ;;  %v3185_v8 = vpack.c.bf16 %v666_v27, %v659_v26 }
  0x2d   :  { %2690 = vmatprep.subr.bf16.mxu0 %v2857_v0  ;;  %v707_v50 = vsub.f32 %v3073_v33, %v706_v51  ;;  %v714_v32 = vsub.f32 %v3095_v47, %v713_v19  ;;  %v701_v61 = vand.u32 4294901760, %v700_v31  ;;  %v728_v27 = vsub.f32 %v3112_v14, %v727_v38 }
  0x2e   :  { %v618_v37 = vand.u32 4294901760, %v3133_v29  ;;  %v673_v39 = vand.u32 4294901760, %v672_v9  ;;  %v721_v9 = vsub.f32 %v3099_v58, %v720_v21  ;;  %v735_v19 = vsub.f32 %v3119_v24, %v734_v63 }
  0x2f   :  { %2545 = vmatpush3.bf16.msra.mxu1 %v3077_v36  ;;  %v708_v5 = vand.u32 4294901760, %v707_v50  ;;  %v715_v26 = vand.u32 4294901760, %v714_v32  ;;  %v729_v7 = vand.u32 4294901760, %v728_v27  ;;  %v3224_v38 = vpack.c.bf16 %v2979_v52, %v2966_v48 }
  0x30   :  { %2546 = vmatprep.subr.bf16.mxu1 %v2857_v0  ;;  %2692 = vmatpush3.bf16.msra.mxu0 %v3103_v60  ;;  %v619_v43 = vsub.f32 %v3133_v29, %v618_v37  ;;  %v722_v51 = vand.u32 4294901760, %v721_v9  ;;  %v736_v21 = vand.u32 4294901760, %v735_v19  ;;  %v3231_v63 = vpack.c.bf16 %v2983_v54, %v2981_v53 }
  0x31   :  { %2693 = vmatprep.subr.bf16.mxu0 %v2857_v0  ;;  %v3208_v46 = vpack.c.bf16 %v708_v5, %v701_v61  ;;  %v3239_v48 = vpack.c.bf16 %v2988_v56, %v2986_v55  ;;  %v3245_v52 = vpack.c.bf16 %v2998_v62, %v2990_v57  ;;  %v3251_v53 = vpack.c.bf16 %v3034_v16, %v3017_v11  ;;  %v1828_v16 = vld [vmem:[%s3443_s3] ss:$0 sm:$0xff] }
  0x32   :  { %v620_v49 = vand.u32 4294901760, %v619_v43  ;;  %v3192_v43 = vpack.c.bf16 %v680_v40, %v673_v39  ;;  %v3214_v1 = vpack.c.bf16 %v722_v51, %v715_v26  ;;  %v3218_v39 = vpack.c.bf16 %v736_v21, %v729_v7 }
  0x33   :  { %2548 = vmatpush3.bf16.msra.mxu1 %v3103_v60  ;;  %v3257_v54 = vpack.c.bf16 %v3073_v33, %v3064_v28  ;;  %v3263_v55 = vpack.c.bf16 %v3099_v58, %v3095_v47  ;;  %v3269_v56 = vpack.c.bf16 %v3119_v24, %v3112_v14 }
  0x34   :  { %2549 = vmatprep.subr.bf16.mxu1 %v2857_v0  ;;  %2695 = vmatpush3.bf16.msra.mxu0 %v3123_v25 }
  0x35   :  { %2696 = vmatprep.subr.bf16.mxu0 %v2857_v0 }
  0x37   :  { %2551 = vmatpush3.bf16.msra.mxu1 %v3123_v25 }
  0x38   :  { %2552 = vmatprep.subr.bf16.mxu1 %v2857_v0  ;;  %2698 = vmatpush3.bf16.msra.mxu0 %v3138_v34 }
  0x39   :  { %2699 = vmatprep.subr.bf16.mxu0 %v2857_v0 }
  0x3b   :  { %2554 = vmatpush3.bf16.msra.mxu1 %v3138_v34 }
  0x3c   :  { %2555 = vmatprep.subr.bf16.mxu1 %v2857_v0 }
  0x3e   :  { %2126 = vmatmul.mubr.f32.vlgmr.msra.gmra.mrb[2].mxu1 %v620_v49  ;;  %v694_v49 = vand.u32 4294901760, %v693_v41 }
  0x3f   :  { %2557 = vmatpush3.bf16.msra.mxu1 %v3163_v2  ;;  %2160 = vmatprep.mubr.msk.f32.mxu1 %vm2858_vm1, %v2859_v3 }
  0x40   :  { %2558 = vmatprep.subr.bf16.mxu1 %v2857_v0  ;;  %v3203_v4 = vpack.c.bf16 %v694_v49, %v687_v15 }
  0x43   :  { %2560 = vmatpush3.bf16.msra.mxu1 %v3173_v6 }
  0x44   :  { %2561 = vmatprep.subr.bf16.mxu1 %v2857_v0 }
  0x47   :  { %2563 = vmatpush3.bf16.msra.mxu1 %v3185_v8 }
  0x48   :  { %2564 = vmatprep.subr.bf16.mxu1 %v2857_v0 }
  0x4b   :  { %2566 = vmatpush3.bf16.msra.mxu1 %v3192_v43 }
  0x4c   :  { %2567 = vmatprep.subr.bf16.mxu1 %v2857_v0 }
  0x4f   :  { %2569 = vmatpush3.bf16.msra.mxu1 %v3203_v4 }
  0x50   :  { %2570 = vmatprep.subr.bf16.mxu1 %v2857_v0 }
  0x53   :  { %2572 = vmatpush3.bf16.msra.mxu1 %v3208_v46 }
  0x54   :  { %2573 = vmatprep.subr.bf16.mxu1 %v2857_v0 }
  0x57   :  { %2575 = vmatpush3.bf16.msra.mxu1 %v3214_v1 }
  0x58   :  { %2576 = vmatprep.subr.bf16.mxu1 %v2857_v0 }
  0x5b   :  { %2578 = vmatpush3.bf16.msra.mxu1 %v3218_v39 }
  0x5c   :  { %2579 = vmatprep.subr.bf16.mxu1 %v2857_v0 }
  0x5e   :  { %2161 = vmatmul.mubr.f32.vlgmr.msra.gmra.mrb[2].mxu1 %v3115_v22 }
  0x5f   :  { %2581 = vmatpush3.bf16.msra.mxu1 %v3224_v38  ;;  %2195 = vmatprep.mubr.msk.f32.mxu1 %vm2858_vm1, %v2859_v3 }
  0x60   :  { %2582 = vmatprep.subr.bf16.mxu1 %v2857_v0 }
  0x63   :  { %2584 = vmatpush3.bf16.msra.mxu1 %v3231_v63 }
  0x64   :  { %2585 = vmatprep.subr.bf16.mxu1 %v2857_v0 }
  0x67   :  { %2587 = vmatpush3.bf16.msra.mxu1 %v3239_v48 }
  0x68   :  { %2588 = vmatprep.subr.bf16.mxu1 %v2857_v0 }
  0x6b   :  { %2590 = vmatpush3.bf16.msra.mxu1 %v3245_v52 }
  0x6c   :  { %2591 = vmatprep.subr.bf16.mxu1 %v2857_v0 }
  0x6f   :  { %2593 = vmatpush3.bf16.msra.mxu1 %v3251_v53 }
  0x70   :  { %2594 = vmatprep.subr.bf16.mxu1 %v2857_v0 }
  0x73   :  { %2596 = vmatpush3.bf16.msra.mxu1 %v3257_v54 }
  0x74   :  { %2597 = vmatprep.subr.bf16.mxu1 %v2857_v0 }
  0x77   :  { %2599 = vmatpush3.bf16.msra.mxu1 %v3263_v55 }
  0x78   :  { %2600 = vmatprep.subr.bf16.mxu1 %v2857_v0 }
  0x7b   :  { %2602 = vmatpush3.bf16.msra.mxu1 %v3269_v56 }
  0x7c   :  { %2603 = vmatprep.subr.bf16.mxu1 %v2857_v0 }
  0x7e   :  { %2196 = vmatmul.mubr.f32.vlgmr.msra.gmra.mrb[2].mxu1 %v3133_v29 }
  0x7f   :  { %2605 = vmatpush3.bf16.msra.mxu1 %v2943_v35  ;;  %2230 = vmatprep.mubr.msk.f32.mxu1 %vm2858_vm1, %v2859_v3 }
  0x80   :  { %2606 = vmatprep.subr.bf16.mxu1 %v2857_v0 }
  0x83   :  { %2608 = vmatpush3.bf16.msra.mxu1 %v2963_v45 }
  0x84   :  { %2609 = vmatprep.subr.bf16.mxu1 %v2857_v0 }
  0x87   :  { %2611 = vmatpush3.bf16.msra.mxu1 %v2995_v59 }
  0x88   :  { %2612 = vmatprep.subr.bf16.mxu1 %v2857_v0 }
  0x8b   :  { %2614 = vmatpush3.bf16.msra.mxu1 %v3044_v18 }
  0x8c   :  { %2615 = vmatprep.subr.bf16.mxu1 %v2857_v0 }
  0x8f   :  { %2617 = vmatpush3.bf16.msra.mxu1 %v3077_v36 }
  0x90   :  { %2618 = vmatprep.subr.bf16.mxu1 %v2857_v0 }
  0x93   :  { %2620 = vmatpush3.bf16.msra.mxu1 %v3103_v60 }
  0x94   :  { %2621 = vmatprep.subr.bf16.mxu1 %v2857_v0 }
  0x97   :  { %2623 = vmatpush3.bf16.msra.mxu1 %v3123_v25 }
  0x98   :  { %2624 = vmatprep.subr.bf16.mxu1 %v2857_v0 }
  0x9b   :  { %2626 = vmatpush3.bf16.msra.mxu1 %v3138_v34 }
  0x9c   :  { %2627 = vmatprep.subr.bf16.mxu1 %v2857_v0 }
  0x9e   :  { %2231 = vmatmul.mubr.f32.vlgmr.msra.gmra.mrb[2].mxu1 %v618_v37 }
  0x9f   :  { %2629 = vmatpush3.bf16.msra.mxu1 %v3023_v12  ;;  %2265 = vmatprep.mubr.msk.f32.mxu1 %vm2858_vm1, %v2859_v3 }
  0xa0   :  { %2630 = vmatprep.subr.bf16.mxu1 %v2857_v0 }
  0xa3   :  { %2632 = vmatpush3.bf16.msra.mxu1 %v3029_v13 }
  0xa4   :  { %2633 = vmatprep.subr.bf16.mxu1 %v2857_v0 }
  0xa7   :  { %2635 = vmatpush3.bf16.msra.mxu1 %v3040_v17 }
  0xa8   :  { %2636 = vmatprep.subr.bf16.mxu1 %v2857_v0 }
  0xab   :  { %2638 = vmatpush3.bf16.msra.mxu1 %v3054_v23 }
  0xac   :  { %2639 = vmatprep.subr.bf16.mxu1 %v2857_v0 }
  0xaf   :  { %2641 = vmatpush3.bf16.msra.mxu1 %v3087_v42 }
  0xb0   :  { %2642 = vmatprep.subr.bf16.mxu1 %v2857_v0 }
  0xb3   :  { %2644 = vmatpush3.bf16.msra.mxu1 %v3110_v10 }
  0xb4   :  { %2645 = vmatprep.subr.bf16.mxu1 %v2857_v0 }
  0xb7   :  { %2647 = vmatpush3.bf16.msra.mxu1 %v3135_v30 }
  0xb8   :  { %2648 = vmatprep.subr.bf16.mxu1 %v2857_v0 }
  0xbb   :  { %2650 = vmatpush3.bf16.msra.mxu1 %v3155_v44 }
  0xbc   :  { %2651 = vmatprep.subr.bf16.mxu1 %v2857_v0 }
  0xbe   :  { %2266 = vmatmul.mubr.f32.vlgmr.msra.gmra.mrb[2].mxu1 %v3115_v22 }
  0xbf   :  { %2653 = vmatpush3.bf16.msra.mxu1 %v2943_v35  ;;  %2300 = vmatprep.mubr.msk.f32.mxu1 %vm2858_vm1, %v2859_v3 }
  0xc0   :  { %2654 = vmatprep.subr.bf16.mxu1 %v2857_v0 }
  0xc3   :  { %2656 = vmatpush3.bf16.msra.mxu1 %v2963_v45 }
  0xc4   :  { %2657 = vmatprep.subr.bf16.mxu1 %v2857_v0 }
  0xc7   :  { %2659 = vmatpush3.bf16.msra.mxu1 %v2995_v59 }
  0xc8   :  { %2660 = vmatprep.subr.bf16.mxu1 %v2857_v0 }
  0xcb   :  { %2662 = vmatpush3.bf16.msra.mxu1 %v3044_v18 }
  0xcc   :  { %2663 = vmatprep.subr.bf16.mxu1 %v2857_v0 }
  0xcf   :  { %2665 = vmatpush3.bf16.msra.mxu1 %v3077_v36 }
  0xd0   :  { %2666 = vmatprep.subr.bf16.mxu1 %v2857_v0 }
  0xd3   :  { %2668 = vmatpush3.bf16.msra.mxu1 %v3103_v60 }
  0xd4   :  { %2669 = vmatprep.subr.bf16.mxu1 %v2857_v0 }
  0xd7   :  { %2671 = vmatpush3.bf16.msra.mxu1 %v3123_v25 }
  0xd8   :  { %2672 = vmatprep.subr.bf16.mxu1 %v2857_v0 }
  0xdb   :  { %2674 = vmatpush3.bf16.msra.mxu1 %v3138_v34 }
  0xde   :  { %2301 = vmatmul.mubr.f32.vlgmr.msra.gmra.mrb[2].mxu1 %v3115_v22 }
  0xed   :  { %v507_v57 = vpop.f32.mrb[0].mxu0 }
  0xee   :  { %v2092_v62 = vpop.f32.mrb[1].mxu0 }
  0xf1   :  { %v282_v11 = vpop.f32.mrb[0].mxu1 }
  0xf2   :  { %v2819_v28 = vadd.f32 %v507_v57, %v282_v11  ;;  %v2071_v33 = vpop.f32.mrb[1].mxu1 }
  0xf4   :  { %vm518_vm4 = vcmp.eq.f32.partialorder %v2819_v28, %v1828_v16 }
  0xf5   :  { %v1177_v47 = vsel %vm518_vm4, %v2916_v20, 0.0 }
  0xf6   :  { %v3336_v58 = vand.u32 4294901760, %v1177_v47 }
  0xf8   :  { %v1260_v14 = vsub.f32 %v1177_v47, %v3336_v58 }
  0xfa   :  { %v1261_v24 = vand.u32 4294901760, %v1260_v14 }
  0xfc   :  { %v1262_v29 = vsub.f32 %v1260_v14, %v1261_v24 }
  0xfe   :  { %v1263_v37 = vand.u32 4294901760, %v1262_v29 }
 0x100   :  { %2336 = vmatmul.mubr.f32.vlgmr.msra.gmra.mrb[2].mxu0 %v1263_v37 }
 0x101   :  { %2701 = vmatpush3.bf16.msra.mxu0 %v3163_v2  ;;  %2370 = vmatprep.mubr.msk.f32.mxu0 %vm2858_vm1, %v2859_v3 }
 0x102   :  { %2702 = vmatprep.subr.bf16.mxu0 %v2857_v0 }
 0x105   :  { %2704 = vmatpush3.bf16.msra.mxu0 %v3173_v6 }
 0x106   :  { %2705 = vmatprep.subr.bf16.mxu0 %v2857_v0 }
 0x109   :  { %2707 = vmatpush3.bf16.msra.mxu0 %v3185_v8 }
 0x10a   :  { %2708 = vmatprep.subr.bf16.mxu0 %v2857_v0 }
 0x10d   :  { %2710 = vmatpush3.bf16.msra.mxu0 %v3192_v43 }
 0x10e   :  { %2711 = vmatprep.subr.bf16.mxu0 %v2857_v0 }
 0x111   :  { %2713 = vmatpush3.bf16.msra.mxu0 %v3203_v4 }
 0x112   :  { %2714 = vmatprep.subr.bf16.mxu0 %v2857_v0 }
 0x115   :  { %2716 = vmatpush3.bf16.msra.mxu0 %v3208_v46 }
 0x116   :  { %2717 = vmatprep.subr.bf16.mxu0 %v2857_v0 }
 0x119   :  { %2719 = vmatpush3.bf16.msra.mxu0 %v3214_v1 }
 0x11a   :  { %2720 = vmatprep.subr.bf16.mxu0 %v2857_v0 }
 0x11d   :  { %2722 = vmatpush3.bf16.msra.mxu0 %v3218_v39 }
 0x11e   :  { %2723 = vmatprep.subr.bf16.mxu0 %v2857_v0 }
 0x120   :  { %2371 = vmatmul.mubr.f32.vlgmr.msra.gmra.mrb[2].mxu0 %v3336_v58 }
 0x121   :  { %2725 = vmatpush3.bf16.msra.mxu0 %v3224_v38  ;;  %2405 = vmatprep.mubr.msk.f32.mxu0 %vm2858_vm1, %v2859_v3 }
 0x122   :  { %2726 = vmatprep.subr.bf16.mxu0 %v2857_v0 }
 0x125   :  { %2728 = vmatpush3.bf16.msra.mxu0 %v3231_v63 }
 0x126   :  { %2729 = vmatprep.subr.bf16.mxu0 %v2857_v0 }
 0x129   :  { %2731 = vmatpush3.bf16.msra.mxu0 %v3239_v48 }
 0x12a   :  { %2732 = vmatprep.subr.bf16.mxu0 %v2857_v0 }
 0x12d   :  { %2734 = vmatpush3.bf16.msra.mxu0 %v3245_v52 }
 0x12e   :  { %2735 = vmatprep.subr.bf16.mxu0 %v2857_v0 }
 0x131   :  { %2737 = vmatpush3.bf16.msra.mxu0 %v3251_v53 }
 0x132   :  { %2738 = vmatprep.subr.bf16.mxu0 %v2857_v0 }
 0x135   :  { %2740 = vmatpush3.bf16.msra.mxu0 %v3257_v54 }
 0x136   :  { %2741 = vmatprep.subr.bf16.mxu0 %v2857_v0 }
 0x139   :  { %2743 = vmatpush3.bf16.msra.mxu0 %v3263_v55 }
 0x13a   :  { %2744 = vmatprep.subr.bf16.mxu0 %v2857_v0 }
 0x13d   :  { %2746 = vmatpush3.bf16.msra.mxu0 %v3269_v56 }
 0x13e   :  { %2747 = vmatprep.subr.bf16.mxu0 %v2857_v0 }
 0x140   :  { %2406 = vmatmul.mubr.f32.vlgmr.msra.gmra.mrb[2].mxu0 %v1260_v14 }
 0x141   :  { %2749 = vmatpush3.bf16.msra.mxu0 %v2943_v35  ;;  %2440 = vmatprep.mubr.msk.f32.mxu0 %vm2858_vm1, %v2859_v3 }
 0x142   :  { %2750 = vmatprep.subr.bf16.mxu0 %v2857_v0 }
 0x145   :  { %2752 = vmatpush3.bf16.msra.mxu0 %v2963_v45 }
 0x146   :  { %2753 = vmatprep.subr.bf16.mxu0 %v2857_v0 }
 0x149   :  { %2755 = vmatpush3.bf16.msra.mxu0 %v2995_v59 }
 0x14a   :  { %2756 = vmatprep.subr.bf16.mxu0 %v2857_v0 }
 0x14d   :  { %2758 = vmatpush3.bf16.msra.mxu0 %v3044_v18 }
 0x14e   :  { %2759 = vmatprep.subr.bf16.mxu0 %v2857_v0 }
 0x151   :  { %2761 = vmatpush3.bf16.msra.mxu0 %v3077_v36 }
 0x152   :  { %2762 = vmatprep.subr.bf16.mxu0 %v2857_v0 }
 0x155   :  { %2764 = vmatpush3.bf16.msra.mxu0 %v3103_v60 }
 0x156   :  { %2765 = vmatprep.subr.bf16.mxu0 %v2857_v0 }
 0x159   :  { %2767 = vmatpush3.bf16.msra.mxu0 %v3123_v25 }
 0x15a   :  { %2768 = vmatprep.subr.bf16.mxu0 %v2857_v0 }
 0x15d   :  { %2770 = vmatpush3.bf16.msra.mxu0 %v3138_v34 }
 0x15e   :  { %2771 = vmatprep.subr.bf16.mxu0 %v2857_v0 }
 0x160   :  { %2441 = vmatmul.mubr.f32.vlgmr.msra.gmra.mrb[2].mxu0 %v1261_v24 }
 0x161   :  { %2773 = vmatpush3.bf16.msra.mxu0 %v3023_v12  ;;  %2475 = vmatprep.mubr.msk.f32.mxu0 %vm2858_vm1, %v2859_v3 }
 0x162   :  { %2774 = vmatprep.subr.bf16.mxu0 %v2857_v0 }
 0x165   :  { %2776 = vmatpush3.bf16.msra.mxu0 %v3029_v13 }
 0x166   :  { %2777 = vmatprep.subr.bf16.mxu0 %v2857_v0 }
 0x169   :  { %2779 = vmatpush3.bf16.msra.mxu0 %v3040_v17 }
 0x16a   :  { %2780 = vmatprep.subr.bf16.mxu0 %v2857_v0 }
 0x16d   :  { %2782 = vmatpush3.bf16.msra.mxu0 %v3054_v23 }
 0x16e   :  { %2783 = vmatprep.subr.bf16.mxu0 %v2857_v0 }
 0x171   :  { %2785 = vmatpush3.bf16.msra.mxu0 %v3087_v42 }
 0x172   :  { %2786 = vmatprep.subr.bf16.mxu0 %v2857_v0 }
 0x175   :  { %2788 = vmatpush3.bf16.msra.mxu0 %v3110_v10 }
 0x176   :  { %2789 = vmatprep.subr.bf16.mxu0 %v2857_v0 }
 0x179   :  { %2791 = vmatpush3.bf16.msra.mxu0 %v3135_v30 }
 0x17a   :  { %2792 = vmatprep.subr.bf16.mxu0 %v2857_v0 }
 0x17d   :  { %2794 = vmatpush3.bf16.msra.mxu0 %v3155_v44 }
 0x17e   :  { %2795 = vmatprep.subr.bf16.mxu0 %v2857_v0 }
 0x180   :  { %2476 = vmatmul.mubr.f32.vlgmr.msra.gmra.mrb[2].mxu0 %v3336_v58 }
 0x181   :  { %2797 = vmatpush3.bf16.msra.mxu0 %v2943_v35  ;;  %2510 = vmatprep.mubr.msk.f32.mxu0 %vm2858_vm1, %v2859_v3 }
 0x182   :  { %2798 = vmatprep.subr.bf16.mxu0 %v2857_v0 }
 0x185   :  { %2800 = vmatpush3.bf16.msra.mxu0 %v2963_v45 }
 0x186   :  { %2801 = vmatprep.subr.bf16.mxu0 %v2857_v0 }
 0x189   :  { %2803 = vmatpush3.bf16.msra.mxu0 %v2995_v59 }
 0x18a   :  { %2804 = vmatprep.subr.bf16.mxu0 %v2857_v0 }
 0x18d   :  { %2806 = vmatpush3.bf16.msra.mxu0 %v3044_v18 }
 0x18e   :  { %2807 = vmatprep.subr.bf16.mxu0 %v2857_v0 }
 0x191   :  { %2809 = vmatpush3.bf16.msra.mxu0 %v3077_v36 }
 0x192   :  { %2810 = vmatprep.subr.bf16.mxu0 %v2857_v0 }
 0x195   :  { %2812 = vmatpush3.bf16.msra.mxu0 %v3103_v60 }
 0x196   :  { %2813 = vmatprep.subr.bf16.mxu0 %v2857_v0 }
 0x199   :  { %2815 = vmatpush3.bf16.msra.mxu0 %v3123_v25 }
 0x19a   :  { %2816 = vmatprep.subr.bf16.mxu0 %v2857_v0 }
 0x19d   :  { %2818 = vmatpush3.bf16.msra.mxu0 %v3138_v34 }
 0x1a0   :  { %2511 = vmatmul.mubr.f32.vlgmr.msra.gmra.mrb[2].mxu0 %v3336_v58 }
 0x1b1   :  { %v1172_v3 = vpop.f32.mrb[2].mxu1 }
 0x1b2   :  { %1176 = vst.msk [vmem:[%s3444_s5] sm:$0xff] %vm48_vm0, %v1172_v3  ;;  %v2302_v20 = vpop.f32.mrb[3].mxu1 }
 0x273   :  { %v1815_v35 = vpop.f32.mrb[2].mxu0 }
 0x274   :  { %1819 = vst.msk [vmem:[%s3445_s6] sm:$0xff] %vm48_vm0, %v1815_v35  ;;  %v2512_v45 = vpop.f32.mrb[3].mxu0 }

</bundles_post_ra>
